<compile_context>
chip_gen: v5e
topology: v5e:2x2
jax: 0.10.0
libtpu: 0.0.40
codegen_flags: <defaults>
</compile_context>

<pallas_src>
import jax
import jax.numpy as jnp
from jax.experimental import pallas as pl
from jax.experimental.pallas import tpu as pltpu

K = 10
NUM_USERS = 5
NUM_ITEMS = 4

# Batch tile on the lane axis.  bf16 (10, 32768) = 640 KiB per embedding buffer;
# 2 inputs x 2 pipeline buffers + f32 bias/out rows ~ 3.5 MiB of VMEM.
TILE_B = 32768

# Streamed dtype for the two dominant (k, B) operands; accumulation stays f32.
EMB_DTYPE = jnp.bfloat16


def _round_up(x, m):
    return ((x + m - 1) // m) * m


def fm_kernel(uemb_ref, iemb_ref, bias_ref, out_ref):
    # Upcast bf16 -> f32 (free under the DMA-bound regime), elementwise multiply on
    # the VPU, cross-sublane reduce on the XLU (separate VLIW slot), bias add on VPU.
    u = uemb_ref[...].astype(jnp.float32)
    v = iemb_ref[...].astype(jnp.float32)
    inter = jnp.sum(u * v, axis=0, keepdims=True)      # (1, tile_b)
    out_ref[...] = bias_ref[...] + inter


def fm_forward(user_emb_t, item_emb_t, bias):
    """user_emb_t/item_emb_t: (k, B) in EMB_DTYPE; bias: (B,) f32 = gb + b_u + b_i."""
    k, B = user_emb_t.shape
    # Choose tile_b so last-tile padding stays < 128 lanes (avoids wasting a step).
    grid_n = pl.cdiv(B, TILE_B)
    tile_b = _round_up(pl.cdiv(B, grid_n), 128)
    bp = tile_b * grid_n
    pad_b = bp - B

    # Only the (small) batch-remainder columns are padded; no transpose copies.
    uemb = jnp.pad(user_emb_t, ((0, 0), (0, pad_b)))
    iemb = jnp.pad(item_emb_t, ((0, 0), (0, pad_b)))
    bias_row = jnp.pad(bias.astype(jnp.float32).reshape(1, B), ((0, 0), (0, pad_b)))

    out = pl.pallas_call(
        fm_kernel,
        out_shape=jax.ShapeDtypeStruct((1, bp), jnp.float32),
        grid=(grid_n,),
        in_specs=[
            # First block dim = full array extent (k=10): exempt from (8,128) rule,
            # so no sublane padding is DMA'd from HBM.
            pl.BlockSpec((k, tile_b), lambda j: (0, j)),   # user embeddings (k, B-tile)
            pl.BlockSpec((k, tile_b), lambda j: (0, j)),   # item embeddings (k, B-tile)
            pl.BlockSpec((1, tile_b), lambda j: (0, j)),   # folded bias row
        ],
        out_specs=pl.BlockSpec((1, tile_b), lambda j: (0, j)),   # lane-dense output row
        compiler_params=pltpu.CompilerParams(
            dimension_semantics=("parallel",),    # batch axis: 2-TC sharding on v7x
            vmem_limit_bytes=32 * 1024 * 1024,    # headroom; within physical on v5e/v6e/v7x
        ),
    )(uemb, iemb, bias_row)

    return out[0, :B]


def init_params(key, num_users, num_items, k):
    ku, ki = jax.random.split(key)
    # nn.init.xavier_uniform_ on weight shape (num, k): bound = sqrt(6/(num + k))
    bu = jnp.sqrt(6.0 / (num_users + k))
    bi = jnp.sqrt(6.0 / (num_items + k))
    user_embedding = jax.random.uniform(ku, (num_users, k), jnp.float32, -bu, bu)
    item_embedding = jax.random.uniform(ki, (num_items, k), jnp.float32, -bi, bi)
    user_bias = jnp.zeros((num_users, 1), jnp.float32)
    item_bias = jnp.zeros((num_items, 1), jnp.float32)
    global_bias = jnp.float32(0.0)
    return user_embedding, item_embedding, user_bias, item_bias, global_bias


def fm_apply(params, user_idx, item_idx):
    user_embedding, item_embedding, user_bias, item_bias, global_bias = params
    # Transpose + cast the TINY (num, k) tables once (free), then gather columns so
    # the gathered streams land directly in the (k, B) working layout -- no extra
    # HBM transpose/pad pass over the dominant operands.
    ue_t = user_embedding.T.astype(EMB_DTYPE)    # (k, num_users)
    ie_t = item_embedding.T.astype(EMB_DTYPE)    # (k, num_items)
    user_emb_t = ue_t[:, user_idx]               # (k, B) bf16
    item_emb_t = ie_t[:, item_idx]               # (k, B) bf16
    # Fold all biases into one lane-dense f32 operand in the wrapper.
    bias = global_bias + user_bias[user_idx, 0] + item_bias[item_idx, 0]   # (B,)
    # TODO(synk): for large tables/batches, fuse the gather in-kernel via
    # PrefetchScalarGridSpec(num_scalar_prefetch=2) + one-hot MXU gather of the
    # VMEM-resident tables, so only indices + outputs ever touch HBM.
    return fm_forward(user_emb_t, item_emb_t, bias)


if __name__ == "__main__":
    key = jax.random.PRNGKey(0)
    pkey, ukey, ikey = jax.random.split(key, 3)
    params = init_params(pkey, NUM_USERS, NUM_ITEMS, K)

    B = 8  # batch of (user, item) index pairs
    user_idx = jax.random.randint(ukey, (B,), 0, NUM_USERS)
    item_idx = jax.random.randint(ikey, (B,), 0, NUM_ITEMS)

    pred = fm_apply(params, user_idx, item_idx)
    pred = jax.block_until_ready(pred)

    # Pure-JAX f32 reference check (relaxed tolerance: embeddings streamed as bf16).
    ue, ie, ub, ib, gb = params
    ref = gb + ub[user_idx, 0] + ib[item_idx, 0] + jnp.sum(ue[user_idx] * ie[item_idx], axis=1)
    assert pred.shape == (B,)
    assert jnp.allclose(pred, ref, atol=2e-2, rtol=2e-2)

    print("KERNEL_OK")
</pallas_src>

<mosaic_0001>
module attributes {stable_mosaic.version = 11 : i64} {
  func.func @fm_kernel(%arg0: i32, %arg1: memref<10x128xbf16, #tpu.memory_space<vmem>>, %arg2: memref<10x128xbf16, #tpu.memory_space<vmem>>, %arg3: memref<1x128xf32, #tpu.memory_space<vmem>>, %arg4: memref<1x128xf32, #tpu.memory_space<vmem>>) attributes {dimension_semantics = [#tpu.dimension_semantics<parallel>], iteration_bounds = array<i64: 1>, scalar_prefetch = 0 : i64, scratch_operands = 0 : i64, tpu.core_type = #tpu.core_type<tc>, window_params = [{transform_indices = @transform_0, window_bounds = array<i64: 10, 128>}, {transform_indices = @transform_1, window_bounds = array<i64: 10, 128>}, {transform_indices = @transform_2, window_bounds = array<i64: 1, 128>}, {transform_indices = @transform_3, window_bounds = array<i64: 1, 128>}]} {
    %c0 = arith.constant 0 : index
    %c0_0 = arith.constant 0 : index
    %0 = vector.load %arg1[%c0, %c0_0] : memref<10x128xbf16, #tpu.memory_space<vmem>>, vector<10x128xbf16>
    %1 = arith.extf %0 : vector<10x128xbf16> to vector<10x128xf32>
    %c0_1 = arith.constant 0 : index
    %c0_2 = arith.constant 0 : index
    %2 = vector.load %arg2[%c0_1, %c0_2] : memref<10x128xbf16, #tpu.memory_space<vmem>>, vector<10x128xbf16>
    %3 = arith.extf %2 : vector<10x128xbf16> to vector<10x128xf32>
    %4 = arith.mulf %1, %3 : vector<10x128xf32>
    %cst = arith.constant dense<0.000000e+00> : vector<128xf32>
    %5 = vector.multi_reduction <add>, %4, %cst [0] : vector<10x128xf32> to vector<128xf32>
    %6 = vector.shape_cast %5 : vector<128xf32> to vector<1x128xf32>
    %c0_3 = arith.constant 0 : index
    %c0_4 = arith.constant 0 : index
    %7 = vector.load %arg3[%c0_3, %c0_4] : memref<1x128xf32, #tpu.memory_space<vmem>>, vector<1x128xf32>
    %8 = arith.addf %7, %6 : vector<1x128xf32>
    %c0_5 = arith.constant 0 : index
    %c0_6 = arith.constant 0 : index
    %9 = vector.load %arg4[%c0_5, %c0_6] : memref<1x128xf32, #tpu.memory_space<vmem>>, vector<1x128xf32>
    tpu.vector_store %arg4[%c0_5, %c0_6], %8 {strides = array<i32>} : memref<1x128xf32, #tpu.memory_space<vmem>>, vector<1x128xf32>,
    return
  }
  func.func @transform_0(%arg0: i32) -> (i32, i32) {
    %c0_i32 = arith.constant 0 : i32
    %c0_i32_0 = arith.constant 0 : i32
    return %c0_i32, %arg0 : i32, i32
  }
  func.func @transform_1(%arg0: i32) -> (i32, i32) {
    %c0_i32 = arith.constant 0 : i32
    %c0_i32_0 = arith.constant 0 : i32
    return %c0_i32, %arg0 : i32, i32
  }
  func.func @transform_2(%arg0: i32) -> (i32, i32) {
    %c0_i32 = arith.constant 0 : i32
    %c0_i32_0 = arith.constant 0 : i32
    return %c0_i32, %arg0 : i32, i32
  }
  func.func @transform_3(%arg0: i32) -> (i32, i32) {
    %c0_i32 = arith.constant 0 : i32
    %c0_i32_0 = arith.constant 0 : i32
    return %c0_i32, %arg0 : i32, i32
  }
}

</mosaic_0001>

<bundles_post_ra>
// kernel: tpu_custom_call.1
= control target key start
LH: loop header
LB: loop body
LE: loop exit
PB: predicated region body
PF: predicated region fallthrough
CT: control target
= control target key end

     0   :  { %8 = vsyncpa [#allocation3], 0  ;;  %s207_s0 = inlined_call_operand.hbm [shape: bf16[10,128], index: 0, kind: input, shape index: {}]   ;;  %s208_s1 = inlined_call_operand.hbm [shape: bf16[10,128], index: 1, kind: input, shape index: {}]   ;;  %s209_s2 = inlined_call_operand.vmem [shape: f32[1,128], index: 2, kind: input, shape index: {}]   ;;  %s210_s3 = inlined_call_operand.hbm [shape: f32[1,128], index: 3, kind: output, shape index: {}]  }
   0x1   :  { %9 = vsyncpa [#allocation6], 0 }
   0x2   :  { %10 = vsyncpa [#allocation4], 0  ;;  %s15_s14 = sshll.u32 %s207_s0, 4  ;;  %s170_s15 = smov [#allocation2]   ;;  %s16_s14 = int_to_ptr.hbm [resolvable:$true] %s15_s14 }
   0x3   :  { %s17_s16 = sshll.u32 %s170_s15, 4  ;;  %s28_s19 = sshll.u32 %s208_s1, 4  ;;  %s18_s16 = int_to_ptr.vmem [resolvable:$true] %s17_s16  ;;  %s29_s19 = int_to_ptr.hbm [resolvable:$true] %s28_s19 }
   0x4   :  { %s171_s20 = smov 64   ;;  %s172_s21 = smov 4  }
   0x5   :  { %23 = dma.hbm_to_vmem [thread:$0]  %s16_s14, 128, %s18_s16, [#allocation3], %s171_s20, %s171_s20, %s172_s21  }
   0x6   :  { %s173_s22 = smov [#allocation5]  }
   0x7   :  { %s30_s23 = sshll.u32 %s173_s22, 4  ;;  %s31_s23 = int_to_ptr.vmem [resolvable:$true] %s30_s23 }
   0x8   :  { %36 = dma.hbm_to_vmem [thread:$0]  %s29_s19, 128, %s31_s23, [#allocation6], %s171_s20, %s171_s20, %s172_s21  }
   0x9   :  { %164 = dma.done.wait [#allocation3], 128  }
   0xa   :  { %165 = vsyncadd [#allocation3], 4294967168 }
   0xb   :  { %166 = dma.done.wait [#allocation6], 128  }
   0xc   :  { %167 = vsyncadd [#allocation6], 4294967168  ;;  %v47_v0 = vld [vmem:[#allocation2] sm:$0xf]  ;;  %v48_v1 = vld [vmem:[#allocation2 + $0x4] sm:$0x1] }
   0xd   :  { %v51_v2 = vld [vmem:[#allocation5] sm:$0xf]  ;;  %v49_v3 = vunpack.c.l.bf16 %v47_v0  ;;  %v50_v4 = vunpack.c.l.bf16 %v48_v1  ;;  %v52_v5 = vld [vmem:[#allocation5 + $0x4] sm:$0x1]  ;;  %vm57_vm0 = vcmask 1041408   ;;  %s174_s24 = smov [#allocation7]  }
   0xe   :  { %v53_v6 = vunpack.c.l.bf16 %v51_v2  ;;  %v54_v7 = vunpack.c.l.bf16 %v52_v5  ;;  %v66_v17 = vld [vmem:[%s209_s2] sm:$0x1]  ;;  %s74_s25 = sshll.u32 %s174_s24, 4  ;;  %s76_s28 = sshll.u32 %s210_s3, 4  ;;  %s75_s25 = int_to_ptr.vmem [resolvable:$true] %s74_s25  ;;  %s77_s28 = int_to_ptr.hbm [resolvable:$true] %s76_s28 }
  0x10   :  { %v55_v8 = vmul.f32 %v53_v6, %v49_v3  ;;  %v56_v9 = vmul.f32 %v54_v7, %v50_v4 }
  0x12   :  { %v58_v10 = vsel %vm57_vm0, %v56_v9, 0.0 }
  0x13   :  { %v59_v11 = vadd.f32 %v58_v10, %v55_v8 }
  0x15   :  { %v60_v12 = vrot.slane %v59_v11, 4 }
  0x17   :  { %v61_v13 = vadd.f32 %v60_v12, %v59_v11 }
  0x19   :  { %v62_v14 = vrot.slane %v61_v13, 2 }
  0x1b   :  { %v63_v15 = vadd.f32 %v62_v14, %v61_v13 }
  0x1d   :  { %v64_v16 = vrot.slane %v63_v15, 1 }
  0x1f   :  { %v65_v18 = vadd.f32 %v64_v16, %v63_v15 }
  0x21   :  { %v67_v19 = vadd.f32 %v66_v17, %v65_v18 }
  0x23   :  { %68 = vst [vmem:[#allocation7] sm:$0x1] %v67_v19 }
  0x24   :  { %79 = dma.vmem_to_hbm [thread:$0]  %s75_s25, 16, %s77_s28, [#allocation4]  }
  0x25   :  { %168 = dma.done.wait [#allocation4], 16  }
  0x26   :  { %169 = vsyncadd [#allocation4], 4294967280 }
  0x27   :  { %84 = vsyncpa [#allocation3], 1 }
  0x28   :  { %85 = vsyncpa [#allocation6], 1 }
  0x29   :  { %86 = vsyncpa [#allocation4], 1 }

</bundles_post_ra>
